<compile_context>
chip_gen: v6e
topology: v6e:2x2x1
jax: 0.10.0
libtpu: 0.0.40
codegen_flags: <defaults>
</compile_context>

<pallas_src>
import jax
import jax.numpy as jnp
from jax.experimental import pallas as pl
from jax.experimental.pallas import tpu as pltpu


def mlp_kernel(x_ref, w1_ref, b1_ref, w2_ref, b2_ref, w3_ref, b3_ref, o_ref):
    x = x_ref[...]                                              # (1, T) lane-dense batch

    # Layer 1 (Linear(1,8)): K=1 -> outer product, pure VPU broadcast multiply.
    h1 = jnp.maximum(w1_ref[...] * x + b1_ref[...], 0.0)       # (8, T)

    # Layer 2 (Linear(8,8)): lane-dense MXU matmul, batch on the lane axis.
    h2 = jnp.dot(w2_ref[...], h1, preferred_element_type=jnp.float32)
    h2 = jnp.maximum(h2 + b2_ref[...], 0.0)                    # (8, T)

    # Layer 3 (Linear(8,1)): also on the MXU.  w3 is zero-padded to (8,8)
    # (row 0 = real weights) so this is the same matmul shape as layer 2;
    # only row 0 of the result is meaningful.
    y8 = jnp.dot(w3_ref[...], h2, preferred_element_type=jnp.float32)  # (8, T)
    o_ref[...] = y8[0:1, :] + b3_ref[0]                        # b3 scalar from SMEM


def _choose_tile(n, tile_n):
    """Lane-tile size: as large as requested, but >=4 blocks for big N (v7x)."""
    tile_n = max(128, (tile_n // 128) * 128)
    n_lanes = ((n + 127) // 128) * 128
    tile = max(128, min(tile_n, n_lanes))
    if n_lanes >= 4 * 4096:
        quarter = ((n_lanes // 4 + 127) // 128) * 128
        tile = min(tile, max(4096, quarter))
    return tile


def mlp_forward(x, w1, b1, w2, b2, w3, b3, *, tile_n=32768):
    """x: (N, 1) float32.  Weights in PyTorch convention:
    w1 (8,1), b1 (8,), w2 (8,8), b2 (8,), w3 (1,8), b3 (1,)."""
    n = x.shape[0]
    tile = _choose_tile(n, tile_n)
    n_blocks = pl.cdiv(n, tile)

    # Free layout plumbing: (N,1) -> (1,N) reshape, no pad, no copy passes.
    xt = x.reshape(1, n).astype(jnp.float32)
    w1c = w1.reshape(8, 1).astype(jnp.float32)
    b1c = b1.reshape(8, 1).astype(jnp.float32)
    w2m = w2.astype(jnp.float32)                               # (out=8, in=8)
    b2c = b2.reshape(8, 1).astype(jnp.float32)
    w3m = jnp.zeros((8, 8), jnp.float32).at[0, :].set(
        w3.reshape(8).astype(jnp.float32))                     # row 0 = w3
    b3c = b3.reshape(1).astype(jnp.float32)                    # scalar -> SMEM

    def const(shape):
        return pl.BlockSpec(shape, lambda i: (0, 0))           # resident in VMEM

    out = pl.pallas_call(
        mlp_kernel,
        out_shape=jax.ShapeDtypeStruct((1, n), jnp.float32),
        grid=(n_blocks,),
        in_specs=[
            pl.BlockSpec((1, tile), lambda i: (0, i)),         # x: streamed per tile
            const((8, 1)),                                     # w1
            const((8, 1)),                                     # b1
            const((8, 8)),                                     # w2
            const((8, 1)),                                     # b2
            const((8, 8)),                                     # w3 (zero-padded)
            pl.BlockSpec(memory_space=pltpu.MemorySpace.SMEM), # b3 scalar
        ],
        out_specs=pl.BlockSpec((1, tile), lambda i: (0, i)),
        compiler_params=pltpu.CompilerParams(
            dimension_semantics=("parallel",),
            vmem_limit_bytes=32 * 1024 * 1024,
        ),
        cost_estimate=pl.CostEstimate(
            flops=176 * n, transcendentals=0, bytes_accessed=8 * n + 640),
    )(xt, w1c, b1c, w2m, b2c, w3m, b3c)

    return out.reshape(n, 1)


def init_params(key):
    # PyTorch-style default Linear init: uniform(-1/sqrt(fan_in), 1/sqrt(fan_in)),
    # weights stored (out, in), biases (out,).
    def linear(key, fan_in, fan_out):
        kw, kb = jax.random.split(key)
        bound = 1.0 / jnp.sqrt(jnp.float32(fan_in))
        w = jax.random.uniform(kw, (fan_out, fan_in), jnp.float32, -bound, bound)
        b = jax.random.uniform(kb, (fan_out,), jnp.float32, -bound, bound)
        return w, b

    k1, k2, k3 = jax.random.split(key, 3)
    w1, b1 = linear(k1, 1, 8)
    w2, b2 = linear(k2, 8, 8)
    w3, b3 = linear(k3, 8, 1)
    return w1, b1, w2, b2, w3, b3


def reference(x, w1, b1, w2, b2, w3, b3):
    h1 = jnp.maximum(x @ w1.T + b1, 0.0)
    h2 = jnp.maximum(h1 @ w2.T + b2, 0.0)
    return h2 @ w3.T + b3


if __name__ == "__main__":
    key = jax.random.PRNGKey(0)
    k_params, k1, k2, k3 = jax.random.split(key, 4)
    params = init_params(k_params)

    # Small batch: single (partially filled) lane block.
    x_small = jax.random.normal(k1, (8, 1), jnp.float32)
    y_small = jax.block_until_ready(mlp_forward(x_small, *params))
    assert y_small.shape == (8, 1)
    assert jnp.allclose(y_small, reference(x_small, *params), atol=1e-5)

    # Multi-block with a ragged last block (exercises padless edge masking).
    x_mid = jax.random.normal(k2, (1000, 1), jnp.float32)
    y_mid = jax.block_until_ready(mlp_forward(x_mid, *params, tile_n=256))
    assert y_mid.shape == (1000, 1)
    assert jnp.allclose(y_mid, reference(x_mid, *params), atol=1e-5)

    # Moderate batch on the default path (exercises the >=4-block heuristic).
    x_big = jax.random.normal(k3, (20000, 1), jnp.float32)
    y_big = jax.block_until_ready(mlp_forward(x_big, *params))
    assert y_big.shape == (20000, 1)
    assert jnp.allclose(y_big, reference(x_big, *params), atol=1e-5)

    print("KERNEL_OK")
</pallas_src>

<mosaic_0001>
module attributes {stable_mosaic.version = 11 : i64} {
  func.func @mlp_kernel(%arg0: i32, %arg1: memref<1x128xf32, #tpu.memory_space<vmem>>, %arg2: memref<8x1xf32, #tpu.memory_space<vmem>>, %arg3: memref<8x1xf32, #tpu.memory_space<vmem>>, %arg4: memref<8x8xf32, #tpu.memory_space<vmem>>, %arg5: memref<8x1xf32, #tpu.memory_space<vmem>>, %arg6: memref<8x8xf32, #tpu.memory_space<vmem>>, %arg7: memref<1xf32, #tpu.memory_space<smem>>, %arg8: memref<1x128xf32, #tpu.memory_space<vmem>>) attributes {dimension_semantics = [#tpu.dimension_semantics<parallel>], iteration_bounds = array<i64: 1>, scalar_prefetch = 0 : i64, scratch_operands = 0 : i64, tpu.core_type = #tpu.core_type<tc>, window_params = [{transform_indices = @transform_0, window_bounds = array<i64: 1, 128>}, {pipeline_mode = #tpu.pipeline_mode<synchronous>, transform_indices = @transform_1, window_bounds = array<i64: 8, 1>}, {pipeline_mode = #tpu.pipeline_mode<synchronous>, transform_indices = @transform_2, window_bounds = array<i64: 8, 1>}, {pipeline_mode = #tpu.pipeline_mode<synchronous>, transform_indices = @transform_3, window_bounds = array<i64: 8, 8>}, {pipeline_mode = #tpu.pipeline_mode<synchronous>, transform_indices = @transform_4, window_bounds = array<i64: 8, 1>}, {pipeline_mode = #tpu.pipeline_mode<synchronous>, transform_indices = @transform_5, window_bounds = array<i64: 8, 8>}, {transform_indices = @transform_6, window_bounds = array<i64: 1>}, {transform_indices = @transform_7, window_bounds = array<i64: 1, 128>}]} {
    %c0 = arith.constant 0 : index
    %c0_0 = arith.constant 0 : index
    %0 = vector.load %arg1[%c0, %c0_0] : memref<1x128xf32, #tpu.memory_space<vmem>>, vector<1x128xf32>
    %c0_1 = arith.constant 0 : index
    %c0_2 = arith.constant 0 : index
    %1 = vector.load %arg2[%c0_1, %c0_2] : memref<8x1xf32, #tpu.memory_space<vmem>>, vector<8x1xf32>
    %2 = vector.broadcast %1 : vector<8x1xf32> to vector<8x128xf32>
    %3 = vector.broadcast %0 : vector<1x128xf32> to vector<8x128xf32>
    %4 = arith.mulf %2, %3 : vector<8x128xf32>
    %c0_3 = arith.constant 0 : index
    %c0_4 = arith.constant 0 : index
    %5 = vector.load %arg3[%c0_3, %c0_4] : memref<8x1xf32, #tpu.memory_space<vmem>>, vector<8x1xf32>
    %6 = vector.broadcast %5 : vector<8x1xf32> to vector<8x128xf32>
    %7 = arith.addf %4, %6 : vector<8x128xf32>
    %cst = arith.constant 0.000000e+00 : f32
    %8 = vector.broadcast %cst : f32 to vector<8x128xf32>
    %9 = arith.maximumf %7, %8 : vector<8x128xf32>
    %c0_5 = arith.constant 0 : index
    %c0_6 = arith.constant 0 : index
    %10 = vector.load %arg4[%c0_5, %c0_6] : memref<8x8xf32, #tpu.memory_space<vmem>>, vector<8x8xf32>
    %cst_7 = arith.constant dense<0.000000e+00> : vector<8x128xf32>
    %11 = tpu.matmul %10, %9, %cst_7 {dimension_numbers = #tpu.dot_dimension_numbers<[1], [0], [0], [1], [0, 0, 1, 1], [], []>} : vector<8x8xf32>, vector<8x128xf32>, vector<8x128xf32> -> vector<8x128xf32>
    %c0_8 = arith.constant 0 : index
    %c0_9 = arith.constant 0 : index
    %12 = vector.load %arg5[%c0_8, %c0_9] : memref<8x1xf32, #tpu.memory_space<vmem>>, vector<8x1xf32>
    %13 = vector.broadcast %12 : vector<8x1xf32> to vector<8x128xf32>
    %14 = arith.addf %11, %13 : vector<8x128xf32>
    %cst_10 = arith.constant 0.000000e+00 : f32
    %15 = vector.broadcast %cst_10 : f32 to vector<8x128xf32>
    %16 = arith.maximumf %14, %15 : vector<8x128xf32>
    %c0_11 = arith.constant 0 : index
    %c0_12 = arith.constant 0 : index
    %17 = vector.load %arg6[%c0_11, %c0_12] : memref<8x8xf32, #tpu.memory_space<vmem>>, vector<8x8xf32>
    %cst_13 = arith.constant dense<0.000000e+00> : vector<8x128xf32>
    %18 = tpu.matmul %17, %16, %cst_13 {dimension_numbers = #tpu.dot_dimension_numbers<[1], [0], [0], [1], [0, 0, 1, 1], [], []>} : vector<8x8xf32>, vector<8x128xf32>, vector<8x128xf32> -> vector<8x128xf32>
    %19 = vector.extract_strided_slice %18 {offsets = [0, 0], sizes = [1, 128], strides = [1, 1]} : vector<8x128xf32> to vector<1x128xf32>
    %c0_14 = arith.constant 0 : index
    %20 = memref.load %arg7[%c0_14] : memref<1xf32, #tpu.memory_space<smem>>
    %21 = vector.broadcast %20 : f32 to vector<1x128xf32>
    %22 = arith.addf %19, %21 : vector<1x128xf32>
    %c0_15 = arith.constant 0 : index
    %c0_16 = arith.constant 0 : index
    %23 = vector.load %arg8[%c0_15, %c0_16] : memref<1x128xf32, #tpu.memory_space<vmem>>, vector<1x128xf32>
    tpu.vector_store %arg8[%c0_15, %c0_16], %22 {strides = array<i32>} : memref<1x128xf32, #tpu.memory_space<vmem>>, vector<1x128xf32>,
    return
  }
  func.func @transform_0(%arg0: i32) -> (i32, i32) {
    %c0_i32 = arith.constant 0 : i32
    %c0_i32_0 = arith.constant 0 : i32
    return %c0_i32, %arg0 : i32, i32
  }
  func.func @transform_1(%arg0: i32) -> (i32, i32) {
    %c0_i32 = arith.constant 0 : i32
    %c0_i32_0 = arith.constant 0 : i32
    %c0_i32_1 = arith.constant 0 : i32
    return %c0_i32, %c0_i32_0 : i32, i32
  }
  func.func @transform_2(%arg0: i32) -> (i32, i32) {
    %c0_i32 = arith.constant 0 : i32
    %c0_i32_0 = arith.constant 0 : i32
    %c0_i32_1 = arith.constant 0 : i32
    return %c0_i32, %c0_i32_0 : i32, i32
  }
  func.func @transform_3(%arg0: i32) -> (i32, i32) {
    %c0_i32 = arith.constant 0 : i32
    %c0_i32_0 = arith.constant 0 : i32
    %c0_i32_1 = arith.constant 0 : i32
    return %c0_i32, %c0_i32_0 : i32, i32
  }
  func.func @transform_4(%arg0: i32) -> (i32, i32) {
    %c0_i32 = arith.constant 0 : i32
    %c0_i32_0 = arith.constant 0 : i32
    %c0_i32_1 = arith.constant 0 : i32
    return %c0_i32, %c0_i32_0 : i32, i32
  }
  func.func @transform_5(%arg0: i32) -> (i32, i32) {
    %c0_i32 = arith.constant 0 : i32
    %c0_i32_0 = arith.constant 0 : i32
    %c0_i32_1 = arith.constant 0 : i32
    return %c0_i32, %c0_i32_0 : i32, i32
  }
  func.func @transform_6(%arg0: i32) -> i32 {
    %c0_i32 = arith.constant 0 : i32
    %c0_i32_0 = arith.constant 0 : i32
    return %c0_i32 : i32
  }
  func.func @transform_7(%arg0: i32) -> (i32, i32) {
    %c0_i32 = arith.constant 0 : i32
    %c0_i32_0 = arith.constant 0 : i32
    return %c0_i32, %arg0 : i32, i32
  }
}

</mosaic_0001>

<bundles_post_ra>
// kernel: tpu_custom_call.1
= control target key start
LH: loop header
LB: loop body
LE: loop exit
PB: predicated region body
PF: predicated region fallthrough
CT: control target
= control target key end

     0   :  { %v269_v1 = vmov 0   ;;  %s337_s0 = inlined_call_operand.vmem [shape: f32[1,8], index: 0, kind: input, shape index: {}]   ;;  %s338_s1 = inlined_call_operand.vmem [shape: f32[8,1], index: 1, kind: input, shape index: {}]   ;;  %s339_s2 = inlined_call_operand.vmem [shape: f32[8,1], index: 2, kind: input, shape index: {}]   ;;  %s340_s3 = inlined_call_operand.vmem [shape: f32[8,8], index: 3, kind: input, shape index: {}]   ;;  %s341_s4 = inlined_call_operand.vmem [shape: f32[8,1], index: 4, kind: input, shape index: {}]   ;;  %s342_s5 = inlined_call_operand.vmem [shape: f32[8,8], index: 5, kind: input, shape index: {}]   ;;  %s343_s6 = inlined_call_operand.<no memory space> [shape: f32[1], index: 6, kind: input, shape index: {}]   ;;  %s344_s7 = inlined_call_operand.hbm [shape: f32[1,8], index: 7, kind: output, shape index: {}]  }
   0x1   :  { %v29_v0 = vld [vmem:[%s338_s1] sm:$0xff]  ;;  %245 = vset.pattern.permute.xlu0 %v269_v1  ;;  %246 = vset.pattern.permute.xlu1 %v269_v1 }
   0x2   :  { %13 = vsyncpa [#allocation4], 0  ;;  %32 = vperm.xlu0 %245, %v29_v0   ;;  %v42_v2 = vld [vmem:[%s339_s2] sm:$0xff]  ;;  %v270_v3 = vmov 0.0   ;;  %vm271_vm0 = vmmov 0   ;;  %vm57_vm1 = vcmask 64512   ;;  %v207_v18 = vstv %s343_s6 }
   0x3   :  { %231 = vmatprep.subr.mxu0 %v270_v3  ;;  %236 = vmatprep.subr.mxu1 %v270_v3  ;;  %v51_v4 = vld [vmem:[%s341_s4] sm:$0xff]  ;;  %s272_s11 = smov [#allocation3]  }
   0x4   :  { %233 = vmatprep.mubr.msk.f32.mxu0 %vm271_vm0, %v270_v3  ;;  %238 = vmatprep.mubr.msk.f32.mxu1 %vm271_vm0, %v270_v3  ;;  %v224_v6 = vld [vmem:[%s337_s0] ss:$0 sm:$0xff] }
   0x5   :  { %54 = vperm.xlu1 %246, %v51_v4   ;;  %v50_v11 = vld [vmem:[%s340_s3] sm:$0xff]  ;;  %s216_s3 = sshll.u32 %s272_s11, 4  ;;  %s217_s3 = int_to_ptr.vmem [resolvable:$true] %s216_s3 }
   0x6   :  { %45 = vperm.xlu0 %245, %v42_v2   ;;  %v132_v17 = vld [vmem:[%s342_s5] sm:$0xff]  ;;  %s247_s12 = scalar_lea.vmem %s217_s3, 16  ;;  %s251_s13 = scalar_lea.vmem %s217_s3, 32 }
   0x7   :  { %p248_p0 = scmp.ne.s32.totalorder %s217_s3, %s247_s12  ;;  %p252_p1 = scmp.lt.s32.totalorder %s217_s3, %s217_s3 }
   0x8   :  { %p253_p2 = scmp.lt.s32.totalorder %s251_s13, %s247_s12 }
   0xa   :  { %p254_p3 = por %p253_p2, %p252_p1 }
   0xc   :  { %p255_p4 = pnand %p254_p3, %p248_p0 }
  0x7d   :  { %v33_v5 = vpop.permute.xlu0 %32 }
  0x7e   :  { %v41_v7 = vmul.f32 %v224_v6, %v33_v5 }
  0x80   :  { %v55_v12 = vpop.permute.xlu1 %54 }
  0x81   :  { %v46_v8 = vpop.permute.xlu0 %45 }
  0x82   :  { %v48_v9 = vadd.f32 %v46_v8, %v41_v7 }
  0x84   :  { %v49_v10 = vmax.f32 %v48_v9, 0.0 }
  0x86   :  { %232 = vmatpush3.msra.mxu0 %v49_v10 }
  0x87   :  { %234 = vmatmul.mubr.msk.f32.vlgmr.msra.gmra.mxu0 %vm57_vm1, %v50_v11 }
 0x147   :  { %v127_v13 = vpop.f32.mrf.mxu0 }
 0x148   :  { %v128_v14 = vadd.f32 %v127_v13, %v55_v12 }
 0x149   :  { %v235_v15 = vpop.f32.mrf.mxu0 }
 0x14a   :  { %v131_v16 = vmax.f32 %v128_v14, 0.0 }
 0x14c   :  { %237 = vmatpush3.msra.mxu1 %v131_v16 }
 0x14d   :  { %239 = vmatmul.mubr.msk.f32.vlgmr.msra.gmra.mxu1 %vm57_vm1, %v132_v17 }
 0x20d   :  { %v202_v19 = vpop.f32.mrf.mxu1 }
 0x20e   :  { %v208_v20 = vadd.f32 %v207_v18, %v202_v19 }
 0x20f   :  { %v240_v21 = vpop.f32.mrf.mxu1 }
 0x210   :  { %209 = vst [vmem:[#allocation3] sm:$0x1] %v208_v20 }
 0x211   :  { %258 = shalt.err (!%p255_p4)
}
 0x212   :  { %219 = dma.vmem_to_hbm [thread:$0]  %s217_s3, 16, %s344_s7, [#allocation4]  }
 0x213   :  { %267 = dma.done.wait [#allocation4], 16  }
 0x214   :  { %268 = vsyncadd [#allocation4], 4294967280 }
 0x215   :  { %223 = vsyncpa [#allocation4], 1 }

</bundles_post_ra>
